<compile_context>
chip_gen: v5e
topology: v5e:2x2
jax: 0.10.0
libtpu: 0.0.40
codegen_flags: <defaults>
</compile_context>

<pallas_src>
import functools

import jax
import jax.numpy as jnp
from jax.experimental import pallas as pl
from jax.experimental.pallas import tpu as pltpu

EPS_PPO = 1e-5

# ---- "config" (ppo_cfg) constants, deterministic, in-script ------------------
CLIP_PARAM = 0.2
VALUE_LOSS_COEF = 0.5
ENTROPY_COEF = 0.01
NUM_STEPS = 8
NUM_PROCESSES = 4

_VMEM = pltpu.MemorySpace.VMEM
_SMEM = pltpu.MemorySpace.SMEM


# ---------------------------------------------------------------------------
# Kernel 1: get_advantages() + one minibatch of update_pol() loss math, fused
# ---------------------------------------------------------------------------
def _fused_ppo_kernel(*refs, num_steps, clip_param, value_loss_coef,
                      entropy_coef, use_internal_adv, emit_advantages,
                      use_clipped_value_loss, use_normalized_advantage):
    it = iter(refs)
    returns_ref = next(it)          # (T+1, P, 1)
    value_preds_ref = next(it)      # (T+1, P, 1)
    alp_ref = next(it)              # (N, 1)
    old_alp_ref = next(it)          # (N, 1)
    values_ref = next(it)           # (N, 1)
    vpb_ref = next(it)              # (N, 1) value_preds_batch
    retb_ref = next(it)             # (N, 1) return_batch
    adv_targ_ref = None if use_internal_adv else next(it)   # (N, 1)
    ent_ref = next(it)              # (1,) SMEM
    adv_out_ref = next(it) if emit_advantages else None     # (T, P, 1)
    loss_out_ref = next(it)         # (4,) SMEM

    # ---- get_advantages(): adv = returns[:-1] - value_preds[:-1], normalize --
    mean = jnp.float32(0.0)
    inv_std = jnp.float32(1.0)
    if emit_advantages or use_internal_adv:
        ret = returns_ref[0:num_steps].astype(jnp.float32)       # (T, P, 1)
        vp = value_preds_ref[0:num_steps].astype(jnp.float32)
        adv = ret - vp
        n_adv = float(adv.size)
        s = jnp.sum(adv)
        ss = jnp.sum(adv * adv)
        mean = s * (1.0 / n_adv)
        # Single-pass unbiased variance, clamped against catastrophic
        # cancellation (can go slightly negative in f32 -> NaN in sqrt).
        var = jnp.maximum((ss - n_adv * mean * mean) * (1.0 / (n_adv - 1.0)),
                          0.0)
        # Exact scalar divide: approx EUP reciprocal's ~2^-14 error can exceed
        # the reference tolerance.
        inv_std = 1.0 / (jnp.sqrt(var) + EPS_PPO)
        if emit_advantages:
            if use_normalized_advantage:
                adv_out_ref[...] = ((adv - mean) * inv_std).astype(
                    adv_out_ref.dtype)
            else:
                adv_out_ref[...] = adv.astype(adv_out_ref.dtype)

    # ---- update_pol() per-minibatch loss math ---------------------------------
    alp = alp_ref[...].astype(jnp.float32)
    old_alp = old_alp_ref[...].astype(jnp.float32)
    values = values_ref[...].astype(jnp.float32)
    vpb = vpb_ref[...].astype(jnp.float32)
    retb = retb_ref[...].astype(jnp.float32)

    if use_internal_adv:
        # Full-rollout minibatch: return_batch/value_preds_batch ARE the rollout
        # returns[:-1]/value_preds[:-1] (in generator order), so the normalized
        # advantages can be rebuilt element-wise from them with the whole-rollout
        # mean/std — no reshape and no flatten-order assumption needed.
        raw = retb - vpb
        adv_targ = (raw - mean) * inv_std if use_normalized_advantage else raw
    else:
        adv_targ = adv_targ_ref[...].astype(jnp.float32)

    inv_nb = 1.0 / float(alp.size)
    ratio = jnp.exp(alp - old_alp)
    surr1 = ratio * adv_targ
    surr2 = jnp.clip(ratio, 1.0 - clip_param, 1.0 + clip_param) * adv_targ
    action_loss = -(jnp.sum(jnp.minimum(surr1, surr2)) * inv_nb)

    if use_clipped_value_loss:
        vpc = vpb + jnp.clip(values - vpb, -clip_param, clip_param)
        vl = (values - retb) ** 2
        vlc = (vpc - retb) ** 2
        value_loss = 0.5 * (jnp.sum(jnp.maximum(vl, vlc)) * inv_nb)
    else:
        value_loss = 0.5 * (jnp.sum((retb - values) ** 2) * inv_nb)

    dist_entropy = ent_ref[0]
    total_loss = (value_loss * value_loss_coef
                  + action_loss
                  - dist_entropy * entropy_coef)

    loss_out_ref[0] = action_loss
    loss_out_ref[1] = value_loss
    loss_out_ref[2] = total_loss
    loss_out_ref[3] = dist_entropy            # echoed for logging parity


def ppo_update_compute(returns, value_preds,
                       action_log_probs, old_action_log_probs,
                       values, value_preds_batch, return_batch, dist_entropy,
                       adv_targ=None, *,
                       return_advantages=True,
                       clip_param=CLIP_PARAM,
                       value_loss_coef=VALUE_LOSS_COEF,
                       entropy_coef=ENTROPY_COEF,
                       use_clipped_value_loss=True,
                       use_normalized_advantage=True):
    """Fused PPO update compute (one pallas_call, no wrapper-side data munging).

    returns, value_preds : (T+1, P, 1) rollout buffers (natural storage shape)
    minibatch tensors    : (N, 1)
    dist_entropy         : (1,) scalar (from actor_critic.evaluate_actions)
    adv_targ             : optional (N, 1); if None, a full-rollout minibatch is
                           assumed and adv_targ is rebuilt in-kernel.

    Returns (adv_norm (T,P,1) or None,
             losses (4,) = [action_loss, value_loss, total_loss, dist_entropy]).
    """
    t_plus_1, num_proc = returns.shape[0], returns.shape[1]
    t = t_plus_1 - 1
    n_batch = action_log_probs.shape[0]
    use_internal_adv = adv_targ is None
    if use_internal_adv:
        assert n_batch == t * num_proc, (
            "internal adv_targ path requires a full-rollout minibatch")

    # (1,) f32 — both ops are no-ops if the caller already passes (1,) f32.
    dist_entropy = jnp.reshape(jnp.asarray(dist_entropy, jnp.float32), (1,))

    inputs = [returns, value_preds, action_log_probs, old_action_log_probs,
              values, value_preds_batch, return_batch]
    in_specs = [pl.BlockSpec(memory_space=_VMEM)] * 7
    if not use_internal_adv:
        inputs.append(adv_targ)
        in_specs.append(pl.BlockSpec(memory_space=_VMEM))
    inputs.append(dist_entropy)
    in_specs.append(pl.BlockSpec(memory_space=_SMEM))

    out_shape = []
    out_specs = []
    if return_advantages:
        out_shape.append(jax.ShapeDtypeStruct((t, num_proc, 1), jnp.float32))
        out_specs.append(pl.BlockSpec(memory_space=_VMEM))
    out_shape.append(jax.ShapeDtypeStruct((4,), jnp.float32))
    out_specs.append(pl.BlockSpec(memory_space=_SMEM))

    kernel = functools.partial(
        _fused_ppo_kernel,
        num_steps=int(t),
        clip_param=float(clip_param),
        value_loss_coef=float(value_loss_coef),
        entropy_coef=float(entropy_coef),
        use_internal_adv=use_internal_adv,
        emit_advantages=bool(return_advantages),
        use_clipped_value_loss=bool(use_clipped_value_loss),
        use_normalized_advantage=bool(use_normalized_advantage))

    outs = pl.pallas_call(
        kernel,
        out_shape=tuple(out_shape),
        in_specs=in_specs,
        out_specs=tuple(out_specs),
    )(*inputs)

    if return_advantages:
        adv_norm, losses = outs
        return adv_norm, losses
    (losses,) = outs
    return None, losses


# ---------------------------------------------------------------------------
# Kernel 2: all ppo_epoch x num_mini_batch loss computations in ONE pallas_call
# (grid axis over minibatches; amortizes per-call dispatch overhead).
# ---------------------------------------------------------------------------
def _ppo_minibatch_loss_kernel(alp_ref, old_alp_ref, adv_ref, values_ref,
                               vpb_ref, retb_ref, ent_ref, loss_ref, *,
                               clip_param, value_loss_coef, entropy_coef,
                               use_clipped_value_loss):
    m = pl.program_id(0)
    alp = alp_ref[...].astype(jnp.float32)        # (1, N, 1)
    old_alp = old_alp_ref[...].astype(jnp.float32)
    adv_targ = adv_ref[...].astype(jnp.float32)
    values = values_ref[...].astype(jnp.float32)
    vpb = vpb_ref[...].astype(jnp.float32)
    retb = retb_ref[...].astype(jnp.float32)

    inv_nb = 1.0 / float(alp.size)
    ratio = jnp.exp(alp - old_alp)
    surr1 = ratio * adv_targ
    surr2 = jnp.clip(ratio, 1.0 - clip_param, 1.0 + clip_param) * adv_targ
    action_loss = -(jnp.sum(jnp.minimum(surr1, surr2)) * inv_nb)

    if use_clipped_value_loss:
        vpc = vpb + jnp.clip(values - vpb, -clip_param, clip_param)
        vl = (values - retb) ** 2
        vlc = (vpc - retb) ** 2
        value_loss = 0.5 * (jnp.sum(jnp.maximum(vl, vlc)) * inv_nb)
    else:
        value_loss = 0.5 * (jnp.sum((retb - values) ** 2) * inv_nb)

    ent = ent_ref[m]
    total_loss = value_loss * value_loss_coef + action_loss - ent * entropy_coef

    loss_ref[m, 0] = action_loss
    loss_ref[m, 1] = value_loss
    loss_ref[m, 2] = total_loss
    loss_ref[m, 3] = ent


def ppo_minibatch_losses_batched(action_log_probs, old_action_log_probs,
                                 adv_targ, values, value_preds_batch,
                                 return_batch, dist_entropy, *,
                                 clip_param=CLIP_PARAM,
                                 value_loss_coef=VALUE_LOSS_COEF,
                                 entropy_coef=ENTROPY_COEF,
                                 use_clipped_value_loss=True):
    """All minibatch tensors stacked (M, N, 1); dist_entropy (M,).

    Returns (M, 4) float32 = [action_loss, value_loss, total_loss, dist_entropy]
    per minibatch; the caller averages over M to reproduce update_pol's
    *_loss_epoch / num_updates bookkeeping.
    """
    m_total, n_mb = action_log_probs.shape[0], action_log_probs.shape[1]
    mb_spec = pl.BlockSpec((1, n_mb, 1), lambda m: (m, 0, 0))
    kernel = functools.partial(
        _ppo_minibatch_loss_kernel,
        clip_param=float(clip_param),
        value_loss_coef=float(value_loss_coef),
        entropy_coef=float(entropy_coef),
        use_clipped_value_loss=bool(use_clipped_value_loss))
    return pl.pallas_call(
        kernel,
        grid=(m_total,),
        in_specs=[mb_spec] * 6 + [pl.BlockSpec(memory_space=_SMEM)],
        out_specs=pl.BlockSpec(memory_space=_SMEM),
        out_shape=jax.ShapeDtypeStruct((m_total, 4), jnp.float32),
        compiler_params=pltpu.CompilerParams(
            # TODO(synk): with a per-minibatch (blocked) loss tile this axis
            # could be marked "parallel" to split across v7x's two TensorCores;
            # the grid-resident SMEM loss table forces "arbitrary" here.
            dimension_semantics=("arbitrary",)),
    )(action_log_probs, old_action_log_probs, adv_targ,
      values, value_preds_batch, return_batch, dist_entropy)


# ---------------------------------------------------------------------------
# Pure-JAX references for correctness checking
# ---------------------------------------------------------------------------
def _ref_get_advantages(returns, value_preds):
    adv = returns[:-1] - value_preds[:-1]
    mean = jnp.mean(adv)
    std = jnp.sqrt(jnp.sum((adv - mean) ** 2) / (adv.size - 1))
    return (adv - mean) / (std + EPS_PPO)


def _ref_ppo_losses(alp, old_alp, adv, values, vp, ret, clip=CLIP_PARAM):
    ratio = jnp.exp(alp - old_alp)
    surr1 = ratio * adv
    surr2 = jnp.clip(ratio, 1.0 - clip, 1.0 + clip) * adv
    action_loss = -jnp.mean(jnp.minimum(surr1, surr2))
    vpc = vp + jnp.clip(values - vp, -clip, clip)
    vl = (values - ret) ** 2
    vlc = (vpc - ret) ** 2
    value_loss = 0.5 * jnp.mean(jnp.maximum(vl, vlc))
    return action_loss, value_loss


# TODO(synk): actor_critic.evaluate_actions / separator nets (update_sep) /
# Adam optimizers / .backward() / grad-norm clipping / process_sepExtMem_masks
# are external modules or autograd/host-side machinery, not a Pallas
# forward-pass hot path; dist_entropy is therefore taken as a scalar input.

if __name__ == "__main__":
    key = jax.random.PRNGKey(0)
    k = jax.random.split(key, 12)

    T, P = NUM_STEPS, NUM_PROCESSES
    N = T * P  # 32

    # Rollout buffers in their natural storage shapes: (num_steps+1, P, 1).
    returns = jax.random.normal(k[0], (T + 1, P, 1), jnp.float32)
    value_preds = jax.random.normal(k[1], (T + 1, P, 1), jnp.float32)

    # Full-rollout minibatch (num_mini_batch = 1): the generator yields the same
    # rollout data flattened, so build the batch tensors consistently.
    action_log_probs = 0.1 * jax.random.normal(k[2], (N, 1), jnp.float32)
    old_action_log_probs = 0.1 * jax.random.normal(k[3], (N, 1), jnp.float32)
    values = jax.random.normal(k[4], (N, 1), jnp.float32)
    value_preds_batch = value_preds[:-1].reshape(N, 1)
    return_batch = returns[:-1].reshape(N, 1)
    dist_entropy = jnp.abs(jax.random.normal(k[5], (1,))).astype(jnp.float32)

    fused = jax.jit(ppo_update_compute, static_argnames=("return_advantages",))

    # --- 1) Fully fused path (internal adv_targ, advantages emitted) ---
    adv_norm, losses = fused(returns, value_preds, action_log_probs,
                             old_action_log_probs, values, value_preds_batch,
                             return_batch, dist_entropy)
    jax.block_until_ready((adv_norm, losses))

    ref_adv = _ref_get_advantages(returns, value_preds)           # (T, P, 1)
    ref_al, ref_vl = _ref_ppo_losses(
        action_log_probs, old_action_log_probs, ref_adv.reshape(N, 1),
        values, value_preds_batch, return_batch)
    ref_total = ref_vl * VALUE_LOSS_COEF + ref_al - dist_entropy[0] * ENTROPY_COEF

    assert jnp.allclose(adv_norm, ref_adv, atol=2e-5, rtol=2e-4), "adv mismatch"
    assert jnp.allclose(losses[0], ref_al, atol=2e-5, rtol=2e-4), "action loss"
    assert jnp.allclose(losses[1], ref_vl, atol=2e-5, rtol=2e-4), "value loss"
    assert jnp.allclose(losses[2], ref_total, atol=2e-5, rtol=2e-4), "total loss"

    # --- 2) External adv_targ path, advantages output skipped ---
    N2 = 16
    adv_targ2 = jax.random.normal(k[6], (N2, 1), jnp.float32)
    alp2 = 0.1 * jax.random.normal(k[7], (N2, 1), jnp.float32)
    old2 = 0.1 * jax.random.normal(k[8], (N2, 1), jnp.float32)
    val2 = jax.random.normal(k[9], (N2, 1), jnp.float32)
    vpb2 = jax.random.normal(k[10], (N2, 1), jnp.float32)
    retb2 = jax.random.normal(k[11], (N2, 1), jnp.float32)
    _, losses2 = fused(returns, value_preds, alp2, old2, val2, vpb2, retb2,
                       dist_entropy, adv_targ2, return_advantages=False)
    jax.block_until_ready(losses2)
    ref_al2, ref_vl2 = _ref_ppo_losses(alp2, old2, adv_targ2, val2, vpb2, retb2)
    ref_tl2 = ref_vl2 * VALUE_LOSS_COEF + ref_al2 - dist_entropy[0] * ENTROPY_COEF
    assert jnp.allclose(losses2[0], ref_al2, atol=2e-5, rtol=2e-4), "action loss 2"
    assert jnp.allclose(losses2[1], ref_vl2, atol=2e-5, rtol=2e-4), "value loss 2"
    assert jnp.allclose(losses2[2], ref_tl2, atol=2e-5, rtol=2e-4), "total loss 2"

    # --- 3) Batched minibatch losses: ppo_epoch=2 x num_mini_batch=2 -> M=4 ---
    M, Nmb = 4, 16
    km = jax.random.split(jax.random.PRNGKey(1), 7)
    b_alp = 0.1 * jax.random.normal(km[0], (M, Nmb, 1), jnp.float32)
    b_old = 0.1 * jax.random.normal(km[1], (M, Nmb, 1), jnp.float32)
    b_adv = jax.random.normal(km[2], (M, Nmb, 1), jnp.float32)
    b_val = jax.random.normal(km[3], (M, Nmb, 1), jnp.float32)
    b_vpb = jax.random.normal(km[4], (M, Nmb, 1), jnp.float32)
    b_ret = jax.random.normal(km[5], (M, Nmb, 1), jnp.float32)
    b_ent = jnp.abs(jax.random.normal(km[6], (M,))).astype(jnp.float32)

    batched = jax.jit(ppo_minibatch_losses_batched)
    b_losses = batched(b_alp, b_old, b_adv, b_val, b_vpb, b_ret, b_ent)
    jax.block_until_ready(b_losses)

    for m in range(M):
        r_al, r_vl = _ref_ppo_losses(b_alp[m], b_old[m], b_adv[m],
                                     b_val[m], b_vpb[m], b_ret[m])
        r_tl = r_vl * VALUE_LOSS_COEF + r_al - b_ent[m] * ENTROPY_COEF
        assert jnp.allclose(b_losses[m, 0], r_al, atol=2e-5, rtol=2e-4), m
        assert jnp.allclose(b_losses[m, 1], r_vl, atol=2e-5, rtol=2e-4), m
        assert jnp.allclose(b_losses[m, 2], r_tl, atol=2e-5, rtol=2e-4), m

    print("KERNEL_OK")
</pallas_src>

<mosaic_0001>
module attributes {stable_mosaic.version = 11 : i64} {
  func.func @_fused_ppo_kernel(%arg0: memref<9x4x1xf32, #tpu.memory_space<vmem>>, %arg1: memref<9x4x1xf32, #tpu.memory_space<vmem>>, %arg2: memref<32x1xf32, #tpu.memory_space<vmem>>, %arg3: memref<32x1xf32, #tpu.memory_space<vmem>>, %arg4: memref<32x1xf32, #tpu.memory_space<vmem>>, %arg5: memref<32x1xf32, #tpu.memory_space<vmem>>, %arg6: memref<32x1xf32, #tpu.memory_space<vmem>>, %arg7: memref<1xf32, #tpu.memory_space<smem>>, %arg8: memref<8x4x1xf32, #tpu.memory_space<vmem>>, %arg9: memref<4xf32, #tpu.memory_space<smem>>) attributes {dimension_semantics = [], scalar_prefetch = 0 : i64, scratch_operands = 0 : i64, tpu.core_type = #tpu.core_type<tc>} {
    %c0 = arith.constant 0 : index
    %c0_0 = arith.constant 0 : index
    %c0_1 = arith.constant 0 : index
    %0 = vector.load %arg0[%c0, %c0_0, %c0_1] : memref<9x4x1xf32, #tpu.memory_space<vmem>>, vector<8x4x1xf32>
    %c0_2 = arith.constant 0 : index
    %c0_3 = arith.constant 0 : index
    %c0_4 = arith.constant 0 : index
    %1 = vector.load %arg1[%c0_2, %c0_3, %c0_4] : memref<9x4x1xf32, #tpu.memory_space<vmem>>, vector<8x4x1xf32>
    %2 = arith.subf %0, %1 : vector<8x4x1xf32>
    %3 = vector.shape_cast %2 : vector<8x4x1xf32> to vector<1x8x4x1xf32>
    %cst = arith.constant dense<0.000000e+00> : vector<1xf32>
    %4 = vector.multi_reduction <add>, %3, %cst [1, 2, 3] : vector<1x8x4x1xf32> to vector<1xf32>
    %5 = vector.shape_cast %4 : vector<1xf32> to vector<1x1x1x1xf32>
    %6 = vector.extract %5[0, 0, 0, 0] : f32 from vector<1x1x1x1xf32>
    %7 = arith.mulf %2, %2 : vector<8x4x1xf32>
    %8 = vector.shape_cast %7 : vector<8x4x1xf32> to vector<1x8x4x1xf32>
    %cst_5 = arith.constant dense<0.000000e+00> : vector<1xf32>
    %9 = vector.multi_reduction <add>, %8, %cst_5 [1, 2, 3] : vector<1x8x4x1xf32> to vector<1xf32>
    %10 = vector.shape_cast %9 : vector<1xf32> to vector<1x1x1x1xf32>
    %11 = vector.extract %10[0, 0, 0, 0] : f32 from vector<1x1x1x1xf32>
    %cst_6 = arith.constant 3.125000e-02 : f32
    %12 = arith.mulf %6, %cst_6 : f32
    %cst_7 = arith.constant 3.200000e+01 : f32
    %13 = arith.mulf %cst_7, %12 : f32
    %14 = arith.mulf %13, %12 : f32
    %15 = arith.subf %11, %14 : f32
    %cst_8 = arith.constant 0.0322580636 : f32
    %16 = arith.mulf %15, %cst_8 : f32
    %cst_9 = arith.constant 0.000000e+00 : f32
    %17 = arith.maximumf %16, %cst_9 : f32
    %18 = math.sqrt %17 : f32
    %cst_10 = arith.constant 9.99999974E-6 : f32
    %19 = arith.addf %18, %cst_10 : f32
    %cst_11 = arith.constant 1.000000e+00 : f32
    %20 = arith.divf %cst_11, %19 : f32
    %21 = vector.broadcast %12 : f32 to vector<8x4x1xf32>
    %22 = arith.subf %2, %21 : vector<8x4x1xf32>
    %23 = vector.broadcast %20 : f32 to vector<8x4x1xf32>
    %24 = arith.mulf %22, %23 : vector<8x4x1xf32>
    %c0_12 = arith.constant 0 : index
    %c0_13 = arith.constant 0 : index
    %c0_14 = arith.constant 0 : index
    %25 = vector.load %arg8[%c0_12, %c0_13, %c0_14] : memref<8x4x1xf32, #tpu.memory_space<vmem>>, vector<8x4x1xf32>
    tpu.vector_store %arg8[%c0_12, %c0_13, %c0_14], %24 {strides = array<i32>} : memref<8x4x1xf32, #tpu.memory_space<vmem>>, vector<8x4x1xf32>,
    %c0_15 = arith.constant 0 : index
    %c0_16 = arith.constant 0 : index
    %26 = vector.load %arg2[%c0_15, %c0_16] : memref<32x1xf32, #tpu.memory_space<vmem>>, vector<32x1xf32>
    %c0_17 = arith.constant 0 : index
    %c0_18 = arith.constant 0 : index
    %27 = vector.load %arg3[%c0_17, %c0_18] : memref<32x1xf32, #tpu.memory_space<vmem>>, vector<32x1xf32>
    %c0_19 = arith.constant 0 : index
    %c0_20 = arith.constant 0 : index
    %28 = vector.load %arg4[%c0_19, %c0_20] : memref<32x1xf32, #tpu.memory_space<vmem>>, vector<32x1xf32>
    %c0_21 = arith.constant 0 : index
    %c0_22 = arith.constant 0 : index
    %29 = vector.load %arg5[%c0_21, %c0_22] : memref<32x1xf32, #tpu.memory_space<vmem>>, vector<32x1xf32>
    %c0_23 = arith.constant 0 : index
    %c0_24 = arith.constant 0 : index
    %30 = vector.load %arg6[%c0_23, %c0_24] : memref<32x1xf32, #tpu.memory_space<vmem>>, vector<32x1xf32>
    %31 = arith.subf %30, %29 : vector<32x1xf32>
    %32 = vector.broadcast %12 : f32 to vector<32x1xf32>
    %33 = arith.subf %31, %32 : vector<32x1xf32>
    %34 = vector.broadcast %20 : f32 to vector<32x1xf32>
    %35 = arith.mulf %33, %34 : vector<32x1xf32>
    %36 = arith.subf %26, %27 : vector<32x1xf32>
    %37 = math.exp %36 : vector<32x1xf32>
    %38 = arith.mulf %37, %35 : vector<32x1xf32>
    %cst_25 = arith.constant 8.000000e-01 : f32
    %cst_26 = arith.constant 1.200000e+00 : f32
    %39 = vector.broadcast %cst_25 : f32 to vector<32x1xf32>
    %40 = arith.maximumf %39, %37 : vector<32x1xf32>
    %41 = vector.broadcast %cst_26 : f32 to vector<32x1xf32>
    %42 = arith.minimumf %41, %40 : vector<32x1xf32>
    %43 = arith.mulf %42, %35 : vector<32x1xf32>
    %44 = arith.minimumf %38, %43 : vector<32x1xf32>
    %45 = vector.shape_cast %44 : vector<32x1xf32> to vector<1x32x1xf32>
    %cst_27 = arith.constant dense<0.000000e+00> : vector<1xf32>
    %46 = vector.multi_reduction <add>, %45, %cst_27 [1, 2] : vector<1x32x1xf32> to vector<1xf32>
    %47 = vector.shape_cast %46 : vector<1xf32> to vector<1x1x1xf32>
    %48 = vector.extract %47[0, 0, 0] : f32 from vector<1x1x1xf32>
    %cst_28 = arith.constant 3.125000e-02 : f32
    %49 = arith.mulf %48, %cst_28 : f32
    %cst_29 = arith.constant 0.000000e+00 : f32
    %50 = arith.subf %cst_29, %49 : f32
    %51 = arith.subf %28, %29 : vector<32x1xf32>
    %cst_30 = arith.constant -2.000000e-01 : f32
    %cst_31 = arith.constant 2.000000e-01 : f32
    %52 = vector.broadcast %cst_30 : f32 to vector<32x1xf32>
    %53 = arith.maximumf %52, %51 : vector<32x1xf32>
    %54 = vector.broadcast %cst_31 : f32 to vector<32x1xf32>
    %55 = arith.minimumf %54, %53 : vector<32x1xf32>
    %56 = arith.addf %29, %55 : vector<32x1xf32>
    %57 = arith.subf %28, %30 : vector<32x1xf32>
    %58 = arith.mulf %57, %57 : vector<32x1xf32>
    %59 = arith.subf %56, %30 : vector<32x1xf32>
    %60 = arith.mulf %59, %59 : vector<32x1xf32>
    %61 = arith.maximumf %58, %60 : vector<32x1xf32>
    %62 = vector.shape_cast %61 : vector<32x1xf32> to vector<1x32x1xf32>
    %cst_32 = arith.constant dense<0.000000e+00> : vector<1xf32>
    %63 = vector.multi_reduction <add>, %62, %cst_32 [1, 2] : vector<1x32x1xf32> to vector<1xf32>
    %64 = vector.shape_cast %63 : vector<1xf32> to vector<1x1x1xf32>
    %65 = vector.extract %64[0, 0, 0] : f32 from vector<1x1x1xf32>
    %cst_33 = arith.constant 3.125000e-02 : f32
    %66 = arith.mulf %65, %cst_33 : f32
    %cst_34 = arith.constant 5.000000e-01 : f32
    %67 = arith.mulf %cst_34, %66 : f32
    %c0_35 = arith.constant 0 : index
    %68 = memref.load %arg7[%c0_35] : memref<1xf32, #tpu.memory_space<smem>>
    %cst_36 = arith.constant 5.000000e-01 : f32
    %69 = arith.mulf %67, %cst_36 : f32
    %70 = arith.addf %69, %50 : f32
    %cst_37 = arith.constant 0.00999999977 : f32
    %71 = arith.mulf %68, %cst_37 : f32
    %72 = arith.subf %70, %71 : f32
    %c0_38 = arith.constant 0 : index
    %73 = memref.load %arg9[%c0_38] : memref<4xf32, #tpu.memory_space<smem>>
    memref.store %50, %arg9[%c0_38] : memref<4xf32, #tpu.memory_space<smem>>
    %c1 = arith.constant 1 : index
    %74 = memref.load %arg9[%c1] : memref<4xf32, #tpu.memory_space<smem>>
    memref.store %67, %arg9[%c1] : memref<4xf32, #tpu.memory_space<smem>>
    %c2 = arith.constant 2 : index
    %75 = memref.load %arg9[%c2] : memref<4xf32, #tpu.memory_space<smem>>
    memref.store %72, %arg9[%c2] : memref<4xf32, #tpu.memory_space<smem>>
    %c3 = arith.constant 3 : index
    %76 = memref.load %arg9[%c3] : memref<4xf32, #tpu.memory_space<smem>>
    memref.store %68, %arg9[%c3] : memref<4xf32, #tpu.memory_space<smem>>
    return
  }
}

</mosaic_0001>

<bundles_post_ra>
// kernel: ppo_update_compute.1
= control target key start
LH: loop header
LB: loop body
LE: loop exit
PB: predicated region body
PF: predicated region fallthrough
CT: control target
= control target key end

     0   :  { %vm57_vm0 = vcmask 3072   ;;  %s694_s0 = inlined_call_operand.vmem [shape: f32[9,4,1], index: 0, kind: input, shape index: {}]   ;;  %s695_s1 = inlined_call_operand.vmem [shape: f32[9,4,1], index: 1, kind: input, shape index: {}]   ;;  %s696_s2 = inlined_call_operand.vmem [shape: f32[32,1], index: 2, kind: input, shape index: {}]   ;;  %s697_s3 = inlined_call_operand.vmem [shape: f32[32,1], index: 3, kind: input, shape index: {}]   ;;  %s698_s4 = inlined_call_operand.vmem [shape: f32[32,1], index: 4, kind: input, shape index: {}]   ;;  %s699_s5 = inlined_call_operand.vmem [shape: f32[32,1], index: 5, kind: input, shape index: {}]   ;;  %s700_s6 = inlined_call_operand.vmem [shape: f32[32,1], index: 6, kind: input, shape index: {}]   ;;  %s701_s7 = inlined_call_operand.<no memory space> [shape: f32[1], index: 7, kind: input, shape index: {}]   ;;  %s702_s8 = inlined_call_operand.vmem [shape: f32[8,4,1], index: 8, kind: output, shape index: {0}]   ;;  %s703_s9 = inlined_call_operand.hbm [shape: f32[4], index: 9, kind: output, shape index: {1}]  }
   0x1   :  { %v33_v0 = vld [vmem:[%s694_s0] sm:$0xf]  ;;  %v34_v1 = vld [vmem:[%s694_s0 + $0x4] sm:$0xf]  ;;  %v35_v2 = vld [vmem:[%s694_s0 + $0x8] sm:$0xf] }
   0x2   :  { %v36_v3 = vld [vmem:[%s694_s0 + $0xc] sm:$0xf]  ;;  %v37_v4 = vld [vmem:[%s694_s0 + $0x10] sm:$0xf]  ;;  %v41_v5 = vld [vmem:[%s695_s1] sm:$0xf] }
   0x3   :  { %v42_v6 = vld [vmem:[%s695_s1 + $0x4] sm:$0xf]  ;;  %v43_v7 = vld [vmem:[%s695_s1 + $0x8] sm:$0xf]  ;;  %v44_v8 = vld [vmem:[%s695_s1 + $0xc] sm:$0xf]  ;;  %v469_v9 = vsub.f32 %v33_v0, %v41_v5 }
   0x4   :  { %v38_v10 = vld [vmem:[%s694_s0 + $0x14] sm:$0xf]  ;;  %v45_v11 = vld [vmem:[%s695_s1 + $0x10] sm:$0xf]  ;;  %v477_v12 = vsub.f32 %v34_v1, %v42_v6  ;;  %v479_v13 = vsub.f32 %v35_v2, %v43_v7  ;;  %v481_v14 = vsub.f32 %v36_v3, %v44_v8 }
   0x5   :  { %v46_v15 = vld [vmem:[%s695_s1 + $0x14] sm:$0xf] }
   0x6   :  { %16 = vsyncpa [#allocation4], 0  ;;  %326 = sst [smem:[#allocation3 + $0x3]] %s701_s7  ;;  %v489_v16 = vsub.f32 %v37_v4, %v45_v11  ;;  %v58_v17 = vsel %vm57_vm0, %v469_v9, 0.0  ;;  %v59_v18 = vsel %vm57_vm0, %v477_v12, 0.0  ;;  %v61_v19 = vsel %vm57_vm0, %v479_v13, 0.0 }
   0x7   :  { %v39_v20 = vld [vmem:[%s694_s0 + $0x18] sm:$0xf]  ;;  %v60_v22 = vadd.f32 %v59_v18, %v58_v17  ;;  %v503_v23 = vsub.f32 %v38_v10, %v46_v15  ;;  %v63_v24 = vsel %vm57_vm0, %v481_v14, 0.0  ;;  %v82_v25 = vmul.f32 %v469_v9, %v469_v9  ;;  %v40_v27 = vld [vmem:[%s694_s0 + $0x1c] sm:$0xf]  ;;  %s390_s27 = smov 0.0  }
   0x8   :  { %v47_v21 = vld [vmem:[%s695_s1 + $0x18] sm:$0xf]  ;;  %v83_v26 = vmul.f32 %v477_v12, %v477_v12  ;;  %v48_v28 = vld [vmem:[%s695_s1 + $0x1c] sm:$0xf]  ;;  %v84_v30 = vmul.f32 %v479_v13, %v479_v13  ;;  %v85_v31 = vmul.f32 %v481_v14, %v481_v14  ;;  %v65_v33 = vsel %vm57_vm0, %v489_v16, 0.0 }
   0x9   :  { %v62_v29 = vadd.f32 %v61_v19, %v60_v22  ;;  %v521_v32 = vsub.f32 %v39_v20, %v47_v21  ;;  %v90_v34 = vsel %vm57_vm0, %v82_v25, 0.0  ;;  %v86_v36 = vmul.f32 %v489_v16, %v489_v16 }
   0xa   :  { %v91_v37 = vsel %vm57_vm0, %v83_v26, 0.0  ;;  %v93_v38 = vsel %vm57_vm0, %v84_v30, 0.0  ;;  %v530_v39 = vsub.f32 %v40_v27, %v48_v28  ;;  %v67_v40 = vsel %vm57_vm0, %v503_v23, 0.0 }
   0xb   :  { %v64_v35 = vadd.f32 %v63_v24, %v62_v29  ;;  %v92_v41 = vadd.f32 %v91_v37, %v90_v34  ;;  %v87_v43 = vmul.f32 %v503_v23, %v503_v23  ;;  %v95_v44 = vsel %vm57_vm0, %v85_v31, 0.0 }
   0xc   :  { %v69_v45 = vsel %vm57_vm0, %v521_v32, 0.0  ;;  %v88_v48 = vmul.f32 %v521_v32, %v521_v32  ;;  %v97_v49 = vsel %vm57_vm0, %v86_v36, 0.0  ;;  %v71_v50 = vsel %vm57_vm0, %v530_v39, 0.0 }
   0xd   :  { %v66_v42 = vadd.f32 %v65_v33, %v64_v35  ;;  %v94_v46 = vadd.f32 %v93_v38, %v92_v41  ;;  %v99_v53 = vsel %vm57_vm0, %v87_v43, 0.0  ;;  %v89_v54 = vmul.f32 %v530_v39, %v530_v39  ;;  %v181_v43 = vld [vmem:[%s697_s3] sm:$0xff] }
   0xe   :  { %v101_v57 = vsel %vm57_vm0, %v88_v48, 0.0  ;;  %v180_v48 = vld [vmem:[%s696_s2 + $0x18] sm:$0xff]  ;;  %vm241_vm7 = vcmask 7168  }
   0xf   :  { %v68_v47 = vadd.f32 %v67_v40, %v66_v42  ;;  %v96_v51 = vadd.f32 %v95_v44, %v94_v46  ;;  %v103_v60 = vsel %vm57_vm0, %v89_v54, 0.0  ;;  %v177_v42 = vld [vmem:[%s696_s2] sm:$0xff]  ;;  %v178_v44 = vld [vmem:[%s696_s2 + $0x8] sm:$0xff]  ;;  %v179_v46 = vld [vmem:[%s696_s2 + $0x10] sm:$0xff] }
  0x11   :  { %v70_v52 = vadd.f32 %v69_v45, %v68_v47  ;;  %v98_v55 = vadd.f32 %v97_v49, %v96_v51  ;;  %v182_v45 = vld [vmem:[%s697_s3 + $0x8] sm:$0xff]  ;;  %v183_v47 = vld [vmem:[%s697_s3 + $0x10] sm:$0xff]  ;;  %v184_v49 = vld [vmem:[%s697_s3 + $0x18] sm:$0xff] }
  0x12   :  { %v210_v51 = vsub.f32 %v178_v44, %v182_v45 }
  0x13   :  { %v72_v56 = vadd.f32 %v71_v50, %v70_v52  ;;  %v100_v58 = vadd.f32 %v99_v53, %v98_v55  ;;  %v209_v50 = vsub.f32 %v177_v42, %v181_v43  ;;  %v211_v52 = vsub.f32 %v179_v46, %v183_v47  ;;  %v185_v55 = vld [vmem:[%s698_s4] sm:$0xff] }
  0x14   :  { %v212_v53 = vsub.f32 %v180_v48, %v184_v49 }
  0x15   :  { %73 = vadd.xlane.f32.xlu0 %v72_v56  ;;  %v102_v59 = vadd.f32 %v101_v57, %v100_v58  ;;  %v213_v54 = vmul.f32 1.442695, %v209_v50  ;;  %v215_v56 = vmul.f32 1.442695, %v210_v51  ;;  %v189_v57 = vld [vmem:[%s699_s5] sm:$0xff] }
  0x16   :  { %v217_v58 = vmul.f32 1.442695, %v211_v52 }
  0x17   :  { %v104_v61 = vadd.f32 %v103_v60, %v102_v59  ;;  %v186_v59 = vld [vmem:[%s698_s4 + $0x8] sm:$0xff]  ;;  %v219_v60 = vmul.f32 1.442695, %v212_v53 }
  0x1d   :  { %105 = vadd.xlane.f32.xlu0 %v104_v61  ;;  %v260_v61 = vsub.f32 %v185_v55, %v189_v57 }
  0x88   :  { %v74_v62 = vpop.xlane.xlu0 %73 }
  0x89   :  { %v75_v63 = vrot.slane %v74_v62, 4 }
  0x8b   :  { %v76_v0 = vadd.f32 %v75_v63, %v74_v62  ;;  %v190_v62 = vld [vmem:[%s699_s5 + $0x8] sm:$0xff]  ;;  %v187_v63 = vld [vmem:[%s698_s4 + $0x10] sm:$0xff] }
  0x8d   :  { %v77_v1 = vrot.slane %v76_v0, 2 }
  0x8f   :  { %v78_v2 = vadd.f32 %v77_v1, %v76_v0  ;;  %v261_v0 = vsub.f32 %v186_v59, %v190_v62  ;;  %v191_v1 = vld [vmem:[%s699_s5 + $0x10] sm:$0xff] }
  0x90   :  { %v106_v3 = vpop.xlane.xlu0 %105 }
  0x91   :  { %v107_v4 = vrot.slane %v106_v3, 4  ;;  %v79_v5 = vrot.slane %v78_v2, 1 }
  0x93   :  { %v108_v6 = vadd.f32 %v107_v4, %v106_v3  ;;  %v80_v7 = vadd.f32 %v79_v5, %v78_v2  ;;  %v188_v2 = vld [vmem:[%s698_s4 + $0x18] sm:$0xff]  ;;  %v262_v3 = vsub.f32 %v187_v63, %v191_v1  ;;  %v346_v4 = vclamps-f32 %v260_v61, 0.2 }
  0x94   :  { %v192_v5 = vld [vmem:[%s699_s5 + $0x18] sm:$0xff] }
  0x95   :  { %v109_v8 = vrot.slane %v108_v6, 2  ;;  %350 = vpush %v80_v7 }
  0x97   :  { %v110_v10 = vadd.f32 %v109_v8, %v108_v6  ;;  %v193_v6 = vld [vmem:[%s700_s6] sm:$0xff]  ;;  %v194_v8 = vld [vmem:[%s700_s6 + $0x8] sm:$0xff] }
  0x99   :  { %v111_v11 = vrot.slane %v110_v10, 1 }
  0x9b   :  { %v112_v15 = vadd.f32 %v111_v11, %v110_v10  ;;  %v195_v10 = vld [vmem:[%s700_s6 + $0x10] sm:$0xff]  ;;  %v196_v11 = vld [vmem:[%s700_s6 + $0x18] sm:$0xff] }
  0x9c   :  { %v278_v44 = vsub.f32 %v187_v63, %v195_v10 }
  0x9d   :  { %352 = vpush %v112_v15  ;;  %v347_v15 = vclamps-f32 %v261_v0, 0.2 }
  0xc6   :  { %s351_s0 = spop %350 }
  0xc7   :  { %s549_s1 = smul.f32 0.03125, %s351_s0 }
  0xc8   :  { %s317_s0 = smul.f32 0.01, %s701_s7 }
  0xc9   :  { %s115_s22 = smul.f32 32.0, %s549_s1  ;;  %v605_v7 = vstv %s549_s1 }
  0xcb   :  { %s116_s23 = smul.f32 %s115_s22, %s549_s1 }
  0xce   :  { %s353_s24 = spop %352 }
  0xcf   :  { %s117_s25 = ssub.f32 %s353_s24, %s116_s23  ;;  %s391_s24 = smov [#allocation3]  }
  0xd1   :  { %s118_s26 = smul.f32 0.032258064, %s117_s25 }
  0xd3   :  { %s119_s28 = smax.f32 %s390_s27, %s118_s26 }
  0xd4   :  { %v120_v17 = vstv %s119_s28 }
  0xd5   :  { %364 = vrsqrt.f32 %v120_v17  ;;  %vm128_vm1 = vcmp.eq.f32.partialorder %v120_v17, inf  ;;  %v131_v26 = vand.u32 2147483648, %v120_v17  ;;  %vm130_vm2 = vcmp.eq.f32.partialorder %v120_v17, 0.0 }
  0xdb   :  { %v365_v18 = vpop.eup %364 }
  0xdc   :  { %v122_v19 = vmul.f32 %v365_v18, %v120_v17 }
  0xde   :  { %v123_v20 = vmul.f32 %v365_v18, %v122_v19 }
  0xe0   :  { %v124_v21 = vmul.f32 0.5, %v123_v20  ;;  %v197_v20 = vsub.f32 %v193_v6, %v189_v57 }
  0xe2   :  { %v125_v22 = vsub.f32 1.5, %v124_v21  ;;  %v348_v21 = vclamps-f32 %v262_v3, 0.2  ;;  %v201_v43 = vsub.f32 %v197_v20, %v605_v7 }
  0xe4   :  { %v126_v24 = vmul.f32 %v365_v18, %v125_v22  ;;  %v263_v18 = vsub.f32 %v188_v2, %v192_v5  ;;  %v272_v22 = vadd.f32 %v346_v4, %v189_v57 }
  0xe6   :  { %v127_v25 = vmul.f32 %v126_v24, %v120_v17 }
  0xe8   :  { %v129_v27 = vsel %vm128_vm1, %v120_v17, %v127_v25  ;;  %v152_v25 = vsub.f32 %v469_v9, %v605_v7  ;;  %v157_v9 = vsub.f32 %v503_v23, %v605_v7  ;;  %v277_v23 = vsub.f32 %v186_v59, %v194_v8 }
  0xe9   :  { %v132_v28 = vsel %vm130_vm2, %v131_v26, %v129_v27  ;;  %v198_v26 = vsub.f32 %v194_v8, %v190_v62  ;;  %v199_v27 = vsub.f32 %v195_v10, %v191_v1 }
  0xea   :  { %354 = vpush %v132_v28  ;;  %v200_v28 = vsub.f32 %v196_v11, %v192_v5  ;;  %v281_v57 = vmul.f32 %v277_v23, %v277_v23 }
  0xeb   :  { %v203_v46 = vsub.f32 %v199_v27, %v605_v7 }
  0xec   :  { %v204_v47 = vsub.f32 %v200_v28, %v605_v7 }
 0x11b   :  { %s355_s29 = spop %354 }
 0x11c   :  { %s134_s30 = sadd.f32 1e-05, %s355_s29 }
 0x11e   :  { %v135_v29 = vstv %s134_s30 }
 0x11f   :  { %366 = vrcp.f32 %v135_v29  ;;  %v147_v34 = vand.u32 2147483648, %v135_v29  ;;  %v145_v36 = vand.u32 2147483647, %v135_v29  ;;  %vm141_vm4 = vweird.f32 %v135_v29 }
 0x120   :  { %368 = vpow2.f32 %v213_v54 }
 0x121   :  { %v148_v38 = vor.u32 1.1754944e-38, %v147_v34  ;;  %vm146_vm6 = vcmp.eq.f32.partialorder %v145_v36, 8.507059e+37  ;;  %370 = vpow2.f32 %v215_v56  ;;  %v273_v34 = vadd.f32 %v347_v15, %v190_v62 }
 0x122   :  { %372 = vpow2.f32 %v217_v58  ;;  %v158_v36 = vsub.f32 %v521_v32, %v605_v7  ;;  %v202_v32 = vsub.f32 %v198_v26, %v605_v7  ;;  %v282_v58 = vmul.f32 %v278_v44, %v278_v44 }
 0x123   :  { %374 = vpow2.f32 %v219_v60  ;;  %v285_v45 = vsub.f32 %v273_v34, %v194_v8 }
 0x125   :  { %v367_v30 = vpop.eup %366  ;;  %v289_v59 = vmul.f32 %v285_v45, %v285_v45 }
 0x126   :  { %v137_v31 = vmul.f32 %v367_v30, %v135_v29  ;;  %vm142_vm3 = vweird.f32 %v367_v30  ;;  %v616_v17 = vpop.eup %368 }
 0x127   :  { %vm143_vm5 = vmor %vm141_vm4, %vm142_vm3  ;;  %v618_v19 = vpop.eup %370 }
 0x128   :  { %v138_v33 = vsub.f32 1.0, %v137_v31  ;;  %v620_v24 = vpop.eup %372  ;;  %v154_v31 = vsub.f32 %v479_v13, %v605_v7  ;;  %v159_v13 = vsub.f32 %v530_v39, %v605_v7 }
 0x129   :  { %v375_v29 = vpop.eup %374  ;;  %v227_v42 = vmax.f32 %v620_v24, 0.8 }
 0x12a   :  { %v139_v35 = vmul.f32 %v367_v30, %v138_v33  ;;  %v155_v33 = vsub.f32 %v481_v14, %v605_v7  ;;  %v226_v14 = vmax.f32 %v618_v19, 0.8 }
 0x12b   :  { %v231_v53 = vmin.f32 %v227_v42, 1.2 }
 0x12c   :  { %v140_v37 = vadd.f32 %v367_v30, %v139_v35  ;;  %v156_v35 = vsub.f32 %v489_v16, %v605_v7  ;;  %v228_v16 = vmax.f32 %v375_v29, 0.8  ;;  %v230_v52 = vmin.f32 %v226_v14, 1.2 }
 0x12e   :  { %v144_v40 = vsel %vm143_vm5, %v367_v30, %v140_v37  ;;  %v153_v30 = vsub.f32 %v477_v12, %v605_v7  ;;  %v349_v37 = vclamps-f32 %v263_v18, 0.2  ;;  %v274_v12 = vadd.f32 %v348_v21, %v191_v1 }
 0x12f   :  { %v149_v41 = vsel %vm146_vm6, %v148_v38, %v144_v40  ;;  %v225_v38 = vmax.f32 %v616_v17, 0.8  ;;  %v276_v40 = vsub.f32 %v185_v55, %v193_v6  ;;  %v232_v54 = vmin.f32 %v228_v16, 1.2 }
 0x130   :  { %356 = vpush %v149_v41  ;;  %v284_v41 = vsub.f32 %v272_v22, %v193_v6  ;;  %v275_v48 = vadd.f32 %v349_v37, %v192_v5  ;;  %v286_v39 = vsub.f32 %v274_v12, %v195_v10  ;;  %v279_v55 = vsub.f32 %v188_v2, %v196_v11 }
 0x131   :  { %v229_v49 = vmin.f32 %v225_v38, 1.2  ;;  %v280_v50 = vmul.f32 %v276_v40, %v276_v40 }
 0x132   :  { %v288_v51 = vmul.f32 %v284_v41, %v284_v41  ;;  %v287_v63 = vsub.f32 %v275_v48, %v196_v11  ;;  %v290_v3 = vmul.f32 %v286_v39, %v286_v39  ;;  %v293_v11 = vmax.f32 %v281_v57, %v289_v59 }
 0x134   :  { %v292_v4 = vmax.f32 %v280_v50, %v288_v51 }
 0x161   :  { %s357_s5 = spop %356 }
 0x162   :  { %v160_v56 = vstv %s357_s5  ;;  %s334_s5 = sshll.u32 %s703_s9, 4  ;;  %s335_s5 = int_to_ptr.hbm [resolvable:$true] %s334_s5 }
 0x163   :  { %v161_v60 = vmul.f32 %v160_v56, %v152_v25  ;;  %v162_v61 = vmul.f32 %v160_v56, %v153_v30  ;;  %v163_v62 = vmul.f32 %v160_v56, %v154_v31  ;;  %v164_v0 = vmul.f32 %v160_v56, %v155_v33 }
 0x164   :  { %v165_v1 = vmul.f32 %v160_v56, %v156_v35  ;;  %v205_v5 = vmul.f32 %v201_v43, %v160_v56  ;;  %v206_v6 = vmul.f32 %v202_v32, %v160_v56  ;;  %v207_v2 = vmul.f32 %v203_v46, %v160_v56 }
 0x165   :  { %169 = vst.msk [vmem:[%s702_s8] sm:$0xf] %vm57_vm0, %v161_v60  ;;  %v208_v7 = vmul.f32 %v204_v47, %v160_v56  ;;  %v166_v8 = vmul.f32 %v160_v56, %v157_v9  ;;  %v167_v10 = vmul.f32 %v160_v56, %v158_v36  ;;  %v168_v15 = vmul.f32 %v160_v56, %v159_v13 }
 0x166   :  { %170 = vst.msk [vmem:[%s702_s8 + $0x4] sm:$0xf] %vm57_vm0, %v162_v61  ;;  %v221_v18 = vmul.f32 %v616_v17, %v205_v5  ;;  %v222_v20 = vmul.f32 %v618_v19, %v206_v6  ;;  %v223_v21 = vmul.f32 %v620_v24, %v207_v2  ;;  %v233_v25 = vmul.f32 %v229_v49, %v205_v5 }
 0x167   :  { %171 = vst.msk [vmem:[%s702_s8 + $0x8] sm:$0xf] %vm57_vm0, %v163_v62  ;;  %v224_v22 = vmul.f32 %v375_v29, %v208_v7  ;;  %v234_v26 = vmul.f32 %v230_v52, %v206_v6  ;;  %v235_v27 = vmul.f32 %v231_v53, %v207_v2  ;;  %v236_v28 = vmul.f32 %v232_v54, %v208_v7 }
 0x168   :  { %172 = vst.msk [vmem:[%s702_s8 + $0xc] sm:$0xf] %vm57_vm0, %v164_v0  ;;  %v237_v17 = vmin.f32 %v221_v18, %v233_v25  ;;  %v283_v29 = vmul.f32 %v279_v55, %v279_v55  ;;  %v291_v30 = vmul.f32 %v287_v63, %v287_v63  ;;  %v294_v31 = vmax.f32 %v282_v58, %v290_v3 }
 0x169   :  { %173 = vst.msk [vmem:[%s702_s8 + $0x10] sm:$0xf] %vm57_vm0, %v165_v1  ;;  %v238_v19 = vmin.f32 %v222_v20, %v234_v26  ;;  %v239_v24 = vmin.f32 %v223_v21, %v235_v27  ;;  %v296_v33 = vsel %vm241_vm7, %v292_v4, 0.0  ;;  %v240_v34 = vmin.f32 %v224_v22, %v236_v28 }
 0x16a   :  { %174 = vst.msk [vmem:[%s702_s8 + $0x14] sm:$0xf] %vm57_vm0, %v166_v8  ;;  %v242_v35 = vsel %vm241_vm7, %v237_v17, 0.0  ;;  %v297_v36 = vsel %vm241_vm7, %v293_v11, 0.0  ;;  %v295_v13 = vmax.f32 %v283_v29, %v291_v30  ;;  %v299_v14 = vsel %vm241_vm7, %v294_v31, 0.0 }
 0x16b   :  { %175 = vst.msk [vmem:[%s702_s8 + $0x18] sm:$0xf] %vm57_vm0, %v167_v10  ;;  %v243_v9 = vsel %vm241_vm7, %v238_v19, 0.0  ;;  %v245_v38 = vsel %vm241_vm7, %v239_v24, 0.0  ;;  %v298_v40 = vadd.f32 %v297_v36, %v296_v33  ;;  %v247_v41 = vsel %vm241_vm7, %v240_v34, 0.0 }
 0x16c   :  { %176 = vst.msk [vmem:[%s702_s8 + $0x1c] sm:$0xf] %vm57_vm0, %v168_v15  ;;  %v244_v37 = vadd.f32 %v243_v9, %v242_v35  ;;  %v301_v43 = vsel %vm241_vm7, %v295_v13, 0.0 }
 0x16d   :  { %v300_v16 = vadd.f32 %v299_v14, %v298_v40 }
 0x16e   :  { %v246_v12 = vadd.f32 %v245_v38, %v244_v37 }
 0x16f   :  { %v302_v23 = vadd.f32 %v301_v43, %v300_v16 }
 0x170   :  { %v248_v42 = vadd.f32 %v247_v41, %v246_v12 }
 0x172   :  { %249 = vadd.xlane.f32.xlu1 %v248_v42 }
 0x17a   :  { %303 = vadd.xlane.f32.xlu1 %v302_v23 }
 0x1e5   :  { %v250_v44 = vpop.xlane.xlu1 %249 }
 0x1e6   :  { %v251_v45 = vrot.slane %v250_v44, 4 }
 0x1e8   :  { %v252_v32 = vadd.f32 %v251_v45, %v250_v44 }
 0x1ea   :  { %v253_v46 = vrot.slane %v252_v32, 2 }
 0x1ec   :  { %v254_v47 = vadd.f32 %v253_v46, %v252_v32 }
 0x1ed   :  { %v304_v48 = vpop.xlane.xlu1 %303 }
 0x1ee   :  { %v305_v49 = vrot.slane %v304_v48, 4  ;;  %v255_v50 = vrot.slane %v254_v47, 1 }
 0x1f0   :  { %v306_v39 = vadd.f32 %v305_v49, %v304_v48  ;;  %v256_v51 = vadd.f32 %v255_v50, %v254_v47 }
 0x1f2   :  { %v307_v52 = vrot.slane %v306_v39, 2  ;;  %358 = vpush %v256_v51 }
 0x1f4   :  { %v308_v53 = vadd.f32 %v307_v52, %v306_v39 }
 0x1f6   :  { %v309_v54 = vrot.slane %v308_v53, 1 }
 0x1f8   :  { %v310_v55 = vadd.f32 %v309_v54, %v308_v53 }
 0x1fa   :  { %360 = vpush %v310_v55 }
 0x223   :  { %s359_s8 = spop %358 }
 0x224   :  { %s258_s15 = smul.f32 0.03125, %s359_s8 }
 0x226   :  { %s259_s16 = ssub.f32 0.0, %s258_s15 }
 0x228   :  { %320 = sst [smem:[#allocation3]] %s259_s16 }
 0x22b   :  { %s361_s17 = spop %360 }
 0x22c   :  { %s312_s18 = smul.f32 0.03125, %s361_s17 }
 0x22e   :  { %s313_s19 = smul.f32 0.5, %s312_s18 }
 0x230   :  { %s315_s22 = smul.f32 0.5, %s313_s19  ;;  %322 = sst [smem:[#allocation3 + $0x1]] %s313_s19 }
 0x232   :  { %s316_s6 = sadd.f32 %s315_s22, %s259_s16 }
 0x234   :  { %s318_s1 = ssub.f32 %s316_s6, %s317_s0 }
 0x236   :  { %324 = sst [smem:[#allocation3 + $0x2]] %s318_s1 }
 0x237   :  { %337 = dma.smem_to_hbm %s391_s24, 16, %s335_s5, [#allocation4]  }
 0x238   :  { %388 = dma.done.wait [#allocation4], 16  }
 0x239   :  { %389 = vsyncadd [#allocation4], 4294967280 }
 0x23a   :  { %344 = sfence }
 0x23b   :  { %345 = vsyncpa [#allocation4], 1 }

</bundles_post_ra>
